<compile_context>
chip_gen: v7x
topology: tpu7x:2x2x1
jax: 0.10.0
libtpu: 0.0.40
codegen_flags: <defaults>
</compile_context>

<pallas_src>
import jax
import jax.numpy as jnp
from jax.experimental import pallas as pl
from jax.experimental.pallas import tpu as pltpu


LANES = 128           # vreg lane width
SUBLANES = 8          # vreg sublane count (f32)
TS_TARGET = 2048      # rows of 128 per grid step (~256K batch elems, 3 MiB of x)


def _round_up(n, m):
    return ((n + m - 1) // m) * m


def robot_critic_kernel(x_ref, w1_ref, b1_ref, w2_ref, b2_ref, o_ref):
    """Tiny 3->8->1 MLP, fully unrolled on the VPU.

    x_ref : (3, TS, 128) VMEM  -- feature-major; batch dense on sublanes+lanes
    w1_ref: (3, 8)  SMEM   b1_ref: (8,) SMEM
    w2_ref: (8,)    SMEM   b2_ref: (1,) SMEM
    o_ref : (TS, 128) VMEM -- sublane+lane-dense output slab
    """
    x0 = x_ref[0]          # (TS, 128)
    x1 = x_ref[1]
    x2 = x_ref[2]

    # Hidden unit 0 seeds the accumulator (saves zeros/bias slab ops on the
    # binding VALU slot); b2 is added exactly once at the end.
    h = w1_ref[0, 0] * x0 + w1_ref[1, 0] * x1 + w1_ref[2, 0] * x2 + b1_ref[0]
    acc = w2_ref[0] * jnp.maximum(h, 0.0)
    for j in range(1, 8):  # fully unrolled at trace time
        h = w1_ref[0, j] * x0 + w1_ref[1, j] * x1 + w1_ref[2, j] * x2 + b1_ref[j]
        acc = acc + w2_ref[j] * jnp.maximum(h, 0.0)

    o_ref[...] = (acc + b2_ref[0]).astype(o_ref.dtype)


def _choose_ts(num_rows):
    """Pick the per-step row-tile (multiple of 8, capped) so that blocks are
    large (amortize pipeline overhead) but the grid still has >=2 steps when
    there is enough work (v7x has 2 TensorCores)."""
    if num_rows <= SUBLANES:
        return num_rows                      # single full-extent block (legal)
    return min(TS_TARGET, _round_up(pl.cdiv(num_rows, 2), SUBLANES))


def robot_critic_forward_featmajor(x3, batch_size, w1, b1, w2, b2, *, ts=None):
    """Core entry point.

    x3: (3, R, 128) float32, feature-major, batch flattened onto (R, 128)
        with zero (or don't-care) padding past `batch_size`.
    Returns (batch_size, 1) float32.
    """
    assert x3.ndim == 3 and x3.shape[0] == 3 and x3.shape[2] == LANES
    assert w1.shape == (3, 8), "w1 must be (in=3, out=8), i.e. torch weight.T"
    assert b1.shape == (8,)
    assert w2.shape == (8,), "w2 must be the squeezed (8,) row of Linear(8,1)"
    assert b2.shape == (1,)

    num_rows = x3.shape[1]
    ts = _choose_ts(num_rows) if ts is None else ts
    grid = (pl.cdiv(num_rows, ts),)

    smem_spec = pl.BlockSpec(memory_space=pltpu.MemorySpace.SMEM)

    out = pl.pallas_call(
        robot_critic_kernel,
        out_shape=jax.ShapeDtypeStruct((num_rows, LANES), jnp.float32),
        grid=grid,
        in_specs=[
            pl.BlockSpec((3, ts, LANES), lambda i: (0, i, 0)),  # x slab (pipelined)
            smem_spec,                                          # w1 (3, 8)
            smem_spec,                                          # b1 (8,)
            smem_spec,                                          # w2 (8,)
            smem_spec,                                          # b2 (1,)
        ],
        out_specs=pl.BlockSpec((ts, LANES), lambda i: (i, 0)),
        compiler_params=pltpu.CompilerParams(
            dimension_semantics=("parallel",),
        ),
    )(x3, w1, b1, w2, b2)

    flat = out.reshape(num_rows * LANES)
    return flat[:batch_size].reshape(batch_size, 1)


def robot_critic_forward(x, w1, b1, w2, b2, *, ts=None):
    """Convenience wrapper matching the PyTorch module: x (B, 3) -> (B, 1).

    Pads the batch only up to the next multiple of 128 lanes and reshapes to
    the feature-major (3, R, 128) layout the kernel consumes.
    """
    B = x.shape[0]
    b_pad = _round_up(max(B, 1), LANES)
    x_t = jnp.pad(x.astype(jnp.float32).T, ((0, 0), (0, b_pad - B)))  # (3, b_pad)
    x3 = x_t.reshape(3, b_pad // LANES, LANES)
    return robot_critic_forward_featmajor(x3, B, w1, b1, w2, b2, ts=ts)


def init_params(key):
    """Deterministic init matching nn.Linear default (uniform +/- 1/sqrt(fan_in))."""
    k1, k2, k3, k4 = jax.random.split(key, 4)
    bound1 = 1.0 / jnp.sqrt(3.0)
    bound2 = 1.0 / jnp.sqrt(8.0)
    w1 = jax.random.uniform(k1, (3, 8), jnp.float32, -bound1, bound1)  # (in, out)
    b1 = jax.random.uniform(k2, (8,), jnp.float32, -bound1, bound1)
    w2 = jax.random.uniform(k3, (8,), jnp.float32, -bound2, bound2)    # (in,) for out=1
    b2 = jax.random.uniform(k4, (1,), jnp.float32, -bound2, bound2)
    return w1, b1, w2, b2


def _reference(x, w1, b1, w2, b2):
    h = jnp.maximum(x @ w1 + b1[None, :], 0.0)
    return h @ w2[:, None] + b2[None, :]


if __name__ == "__main__":
    key = jax.random.PRNGKey(0)
    pkey, xkey1, xkey2 = jax.random.split(key, 3)
    w1, b1, w2, b2 = init_params(pkey)

    # Small batch (the module's natural use case: 3 observation features).
    B = 8
    x = jax.random.normal(xkey1, (B, 3), jnp.float32)
    out = jax.block_until_ready(robot_critic_forward(x, w1, b1, w2, b2))
    ref = _reference(x, w1, b1, w2, b2)
    assert out.shape == (B, 1)
    assert jnp.allclose(out, ref, atol=1e-5, rtol=1e-5)

    # Ragged batch exercising the 128-lane padding, a multi-step "parallel"
    # grid, and Pallas masking of the partial last row-block.
    B2 = 2085  # -> b_pad = 2176, R = 17 rows, TS = 16, grid = (2,)
    x2 = jax.random.normal(xkey2, (B2, 3), jnp.float32)
    out2 = jax.block_until_ready(robot_critic_forward(x2, w1, b1, w2, b2))
    ref2 = _reference(x2, w1, b1, w2, b2)
    assert out2.shape == (B2, 1)
    assert jnp.allclose(out2, ref2, atol=1e-5, rtol=1e-5)

    print("KERNEL_OK")
</pallas_src>

<mosaic_0001>
module attributes {stable_mosaic.version = 11 : i64} {
  func.func @robot_critic_kernel(%arg0: i32, %arg1: memref<3x1x128xf32, #tpu.memory_space<vmem>>, %arg2: memref<3x8xf32, #tpu.memory_space<smem>>, %arg3: memref<8xf32, #tpu.memory_space<smem>>, %arg4: memref<8xf32, #tpu.memory_space<smem>>, %arg5: memref<1xf32, #tpu.memory_space<smem>>, %arg6: memref<1x128xf32, #tpu.memory_space<vmem>>) attributes {dimension_semantics = [#tpu.dimension_semantics<parallel>], iteration_bounds = array<i64: 1>, scalar_prefetch = 0 : i64, scratch_operands = 0 : i64, tpu.core_type = #tpu.core_type<tc>, window_params = [{transform_indices = @transform_0, window_bounds = array<i64: 3, 1, 128>}, {transform_indices = @transform_1, window_bounds = array<i64: 3, 8>}, {transform_indices = @transform_2, window_bounds = array<i64: 8>}, {transform_indices = @transform_3, window_bounds = array<i64: 8>}, {transform_indices = @transform_4, window_bounds = array<i64: 1>}, {transform_indices = @transform_5, window_bounds = array<i64: 1, 128>}]} {
    %c0 = arith.constant 0 : index
    %c0_0 = arith.constant 0 : index
    %c0_1 = arith.constant 0 : index
    %0 = vector.load %arg1[%c0, %c0_0, %c0_1] : memref<3x1x128xf32, #tpu.memory_space<vmem>>, vector<1x1x128xf32>
    %1 = vector.shape_cast %0 : vector<1x1x128xf32> to vector<1x128xf32>
    %c1 = arith.constant 1 : index
    %c0_2 = arith.constant 0 : index
    %c0_3 = arith.constant 0 : index
    %2 = vector.load %arg1[%c1, %c0_2, %c0_3] : memref<3x1x128xf32, #tpu.memory_space<vmem>>, vector<1x1x128xf32>
    %3 = vector.shape_cast %2 : vector<1x1x128xf32> to vector<1x128xf32>
    %c2 = arith.constant 2 : index
    %c0_4 = arith.constant 0 : index
    %c0_5 = arith.constant 0 : index
    %4 = vector.load %arg1[%c2, %c0_4, %c0_5] : memref<3x1x128xf32, #tpu.memory_space<vmem>>, vector<1x1x128xf32>
    %5 = vector.shape_cast %4 : vector<1x1x128xf32> to vector<1x128xf32>
    %c0_6 = arith.constant 0 : index
    %c0_7 = arith.constant 0 : index
    %6 = memref.load %arg2[%c0_6, %c0_7] : memref<3x8xf32, #tpu.memory_space<smem>>
    %7 = vector.broadcast %6 : f32 to vector<1x128xf32>
    %8 = arith.mulf %7, %1 : vector<1x128xf32>
    %c1_8 = arith.constant 1 : index
    %c0_9 = arith.constant 0 : index
    %9 = memref.load %arg2[%c1_8, %c0_9] : memref<3x8xf32, #tpu.memory_space<smem>>
    %10 = vector.broadcast %9 : f32 to vector<1x128xf32>
    %11 = arith.mulf %10, %3 : vector<1x128xf32>
    %12 = arith.addf %8, %11 : vector<1x128xf32>
    %c2_10 = arith.constant 2 : index
    %c0_11 = arith.constant 0 : index
    %13 = memref.load %arg2[%c2_10, %c0_11] : memref<3x8xf32, #tpu.memory_space<smem>>
    %14 = vector.broadcast %13 : f32 to vector<1x128xf32>
    %15 = arith.mulf %14, %5 : vector<1x128xf32>
    %16 = arith.addf %12, %15 : vector<1x128xf32>
    %c0_12 = arith.constant 0 : index
    %17 = memref.load %arg3[%c0_12] : memref<8xf32, #tpu.memory_space<smem>>
    %18 = vector.broadcast %17 : f32 to vector<1x128xf32>
    %19 = arith.addf %16, %18 : vector<1x128xf32>
    %c0_13 = arith.constant 0 : index
    %20 = memref.load %arg4[%c0_13] : memref<8xf32, #tpu.memory_space<smem>>
    %cst = arith.constant 0.000000e+00 : f32
    %21 = vector.broadcast %cst : f32 to vector<1x128xf32>
    %22 = arith.maximumf %19, %21 : vector<1x128xf32>
    %23 = vector.broadcast %20 : f32 to vector<1x128xf32>
    %24 = arith.mulf %23, %22 : vector<1x128xf32>
    %c0_14 = arith.constant 0 : index
    %c1_15 = arith.constant 1 : index
    %25 = memref.load %arg2[%c0_14, %c1_15] : memref<3x8xf32, #tpu.memory_space<smem>>
    %26 = vector.broadcast %25 : f32 to vector<1x128xf32>
    %27 = arith.mulf %26, %1 : vector<1x128xf32>
    %c1_16 = arith.constant 1 : index
    %c1_17 = arith.constant 1 : index
    %28 = memref.load %arg2[%c1_16, %c1_17] : memref<3x8xf32, #tpu.memory_space<smem>>
    %29 = vector.broadcast %28 : f32 to vector<1x128xf32>
    %30 = arith.mulf %29, %3 : vector<1x128xf32>
    %31 = arith.addf %27, %30 : vector<1x128xf32>
    %c2_18 = arith.constant 2 : index
    %c1_19 = arith.constant 1 : index
    %32 = memref.load %arg2[%c2_18, %c1_19] : memref<3x8xf32, #tpu.memory_space<smem>>
    %33 = vector.broadcast %32 : f32 to vector<1x128xf32>
    %34 = arith.mulf %33, %5 : vector<1x128xf32>
    %35 = arith.addf %31, %34 : vector<1x128xf32>
    %c1_20 = arith.constant 1 : index
    %36 = memref.load %arg3[%c1_20] : memref<8xf32, #tpu.memory_space<smem>>
    %37 = vector.broadcast %36 : f32 to vector<1x128xf32>
    %38 = arith.addf %35, %37 : vector<1x128xf32>
    %c1_21 = arith.constant 1 : index
    %39 = memref.load %arg4[%c1_21] : memref<8xf32, #tpu.memory_space<smem>>
    %cst_22 = arith.constant 0.000000e+00 : f32
    %40 = vector.broadcast %cst_22 : f32 to vector<1x128xf32>
    %41 = arith.maximumf %38, %40 : vector<1x128xf32>
    %42 = vector.broadcast %39 : f32 to vector<1x128xf32>
    %43 = arith.mulf %42, %41 : vector<1x128xf32>
    %44 = arith.addf %24, %43 : vector<1x128xf32>
    %c0_23 = arith.constant 0 : index
    %c2_24 = arith.constant 2 : index
    %45 = memref.load %arg2[%c0_23, %c2_24] : memref<3x8xf32, #tpu.memory_space<smem>>
    %46 = vector.broadcast %45 : f32 to vector<1x128xf32>
    %47 = arith.mulf %46, %1 : vector<1x128xf32>
    %c1_25 = arith.constant 1 : index
    %c2_26 = arith.constant 2 : index
    %48 = memref.load %arg2[%c1_25, %c2_26] : memref<3x8xf32, #tpu.memory_space<smem>>
    %49 = vector.broadcast %48 : f32 to vector<1x128xf32>
    %50 = arith.mulf %49, %3 : vector<1x128xf32>
    %51 = arith.addf %47, %50 : vector<1x128xf32>
    %c2_27 = arith.constant 2 : index
    %c2_28 = arith.constant 2 : index
    %52 = memref.load %arg2[%c2_27, %c2_28] : memref<3x8xf32, #tpu.memory_space<smem>>
    %53 = vector.broadcast %52 : f32 to vector<1x128xf32>
    %54 = arith.mulf %53, %5 : vector<1x128xf32>
    %55 = arith.addf %51, %54 : vector<1x128xf32>
    %c2_29 = arith.constant 2 : index
    %56 = memref.load %arg3[%c2_29] : memref<8xf32, #tpu.memory_space<smem>>
    %57 = vector.broadcast %56 : f32 to vector<1x128xf32>
    %58 = arith.addf %55, %57 : vector<1x128xf32>
    %c2_30 = arith.constant 2 : index
    %59 = memref.load %arg4[%c2_30] : memref<8xf32, #tpu.memory_space<smem>>
    %cst_31 = arith.constant 0.000000e+00 : f32
    %60 = vector.broadcast %cst_31 : f32 to vector<1x128xf32>
    %61 = arith.maximumf %58, %60 : vector<1x128xf32>
    %62 = vector.broadcast %59 : f32 to vector<1x128xf32>
    %63 = arith.mulf %62, %61 : vector<1x128xf32>
    %64 = arith.addf %44, %63 : vector<1x128xf32>
    %c0_32 = arith.constant 0 : index
    %c3 = arith.constant 3 : index
    %65 = memref.load %arg2[%c0_32, %c3] : memref<3x8xf32, #tpu.memory_space<smem>>
    %66 = vector.broadcast %65 : f32 to vector<1x128xf32>
    %67 = arith.mulf %66, %1 : vector<1x128xf32>
    %c1_33 = arith.constant 1 : index
    %c3_34 = arith.constant 3 : index
    %68 = memref.load %arg2[%c1_33, %c3_34] : memref<3x8xf32, #tpu.memory_space<smem>>
    %69 = vector.broadcast %68 : f32 to vector<1x128xf32>
    %70 = arith.mulf %69, %3 : vector<1x128xf32>
    %71 = arith.addf %67, %70 : vector<1x128xf32>
    %c2_35 = arith.constant 2 : index
    %c3_36 = arith.constant 3 : index
    %72 = memref.load %arg2[%c2_35, %c3_36] : memref<3x8xf32, #tpu.memory_space<smem>>
    %73 = vector.broadcast %72 : f32 to vector<1x128xf32>
    %74 = arith.mulf %73, %5 : vector<1x128xf32>
    %75 = arith.addf %71, %74 : vector<1x128xf32>
    %c3_37 = arith.constant 3 : index
    %76 = memref.load %arg3[%c3_37] : memref<8xf32, #tpu.memory_space<smem>>
    %77 = vector.broadcast %76 : f32 to vector<1x128xf32>
    %78 = arith.addf %75, %77 : vector<1x128xf32>
    %c3_38 = arith.constant 3 : index
    %79 = memref.load %arg4[%c3_38] : memref<8xf32, #tpu.memory_space<smem>>
    %cst_39 = arith.constant 0.000000e+00 : f32
    %80 = vector.broadcast %cst_39 : f32 to vector<1x128xf32>
    %81 = arith.maximumf %78, %80 : vector<1x128xf32>
    %82 = vector.broadcast %79 : f32 to vector<1x128xf32>
    %83 = arith.mulf %82, %81 : vector<1x128xf32>
    %84 = arith.addf %64, %83 : vector<1x128xf32>
    %c0_40 = arith.constant 0 : index
    %c4 = arith.constant 4 : index
    %85 = memref.load %arg2[%c0_40, %c4] : memref<3x8xf32, #tpu.memory_space<smem>>
    %86 = vector.broadcast %85 : f32 to vector<1x128xf32>
    %87 = arith.mulf %86, %1 : vector<1x128xf32>
    %c1_41 = arith.constant 1 : index
    %c4_42 = arith.constant 4 : index
    %88 = memref.load %arg2[%c1_41, %c4_42] : memref<3x8xf32, #tpu.memory_space<smem>>
    %89 = vector.broadcast %88 : f32 to vector<1x128xf32>
    %90 = arith.mulf %89, %3 : vector<1x128xf32>
    %91 = arith.addf %87, %90 : vector<1x128xf32>
    %c2_43 = arith.constant 2 : index
    %c4_44 = arith.constant 4 : index
    %92 = memref.load %arg2[%c2_43, %c4_44] : memref<3x8xf32, #tpu.memory_space<smem>>
    %93 = vector.broadcast %92 : f32 to vector<1x128xf32>
    %94 = arith.mulf %93, %5 : vector<1x128xf32>
    %95 = arith.addf %91, %94 : vector<1x128xf32>
    %c4_45 = arith.constant 4 : index
    %96 = memref.load %arg3[%c4_45] : memref<8xf32, #tpu.memory_space<smem>>
    %97 = vector.broadcast %96 : f32 to vector<1x128xf32>
    %98 = arith.addf %95, %97 : vector<1x128xf32>
    %c4_46 = arith.constant 4 : index
    %99 = memref.load %arg4[%c4_46] : memref<8xf32, #tpu.memory_space<smem>>
    %cst_47 = arith.constant 0.000000e+00 : f32
    %100 = vector.broadcast %cst_47 : f32 to vector<1x128xf32>
    %101 = arith.maximumf %98, %100 : vector<1x128xf32>
    %102 = vector.broadcast %99 : f32 to vector<1x128xf32>
    %103 = arith.mulf %102, %101 : vector<1x128xf32>
    %104 = arith.addf %84, %103 : vector<1x128xf32>
    %c0_48 = arith.constant 0 : index
    %c5 = arith.constant 5 : index
    %105 = memref.load %arg2[%c0_48, %c5] : memref<3x8xf32, #tpu.memory_space<smem>>
    %106 = vector.broadcast %105 : f32 to vector<1x128xf32>
    %107 = arith.mulf %106, %1 : vector<1x128xf32>
    %c1_49 = arith.constant 1 : index
    %c5_50 = arith.constant 5 : index
    %108 = memref.load %arg2[%c1_49, %c5_50] : memref<3x8xf32, #tpu.memory_space<smem>>
    %109 = vector.broadcast %108 : f32 to vector<1x128xf32>
    %110 = arith.mulf %109, %3 : vector<1x128xf32>
    %111 = arith.addf %107, %110 : vector<1x128xf32>
    %c2_51 = arith.constant 2 : index
    %c5_52 = arith.constant 5 : index
    %112 = memref.load %arg2[%c2_51, %c5_52] : memref<3x8xf32, #tpu.memory_space<smem>>
    %113 = vector.broadcast %112 : f32 to vector<1x128xf32>
    %114 = arith.mulf %113, %5 : vector<1x128xf32>
    %115 = arith.addf %111, %114 : vector<1x128xf32>
    %c5_53 = arith.constant 5 : index
    %116 = memref.load %arg3[%c5_53] : memref<8xf32, #tpu.memory_space<smem>>
    %117 = vector.broadcast %116 : f32 to vector<1x128xf32>
    %118 = arith.addf %115, %117 : vector<1x128xf32>
    %c5_54 = arith.constant 5 : index
    %119 = memref.load %arg4[%c5_54] : memref<8xf32, #tpu.memory_space<smem>>
    %cst_55 = arith.constant 0.000000e+00 : f32
    %120 = vector.broadcast %cst_55 : f32 to vector<1x128xf32>
    %121 = arith.maximumf %118, %120 : vector<1x128xf32>
    %122 = vector.broadcast %119 : f32 to vector<1x128xf32>
    %123 = arith.mulf %122, %121 : vector<1x128xf32>
    %124 = arith.addf %104, %123 : vector<1x128xf32>
    %c0_56 = arith.constant 0 : index
    %c6 = arith.constant 6 : index
    %125 = memref.load %arg2[%c0_56, %c6] : memref<3x8xf32, #tpu.memory_space<smem>>
    %126 = vector.broadcast %125 : f32 to vector<1x128xf32>
    %127 = arith.mulf %126, %1 : vector<1x128xf32>
    %c1_57 = arith.constant 1 : index
    %c6_58 = arith.constant 6 : index
    %128 = memref.load %arg2[%c1_57, %c6_58] : memref<3x8xf32, #tpu.memory_space<smem>>
    %129 = vector.broadcast %128 : f32 to vector<1x128xf32>
    %130 = arith.mulf %129, %3 : vector<1x128xf32>
    %131 = arith.addf %127, %130 : vector<1x128xf32>
    %c2_59 = arith.constant 2 : index
    %c6_60 = arith.constant 6 : index
    %132 = memref.load %arg2[%c2_59, %c6_60] : memref<3x8xf32, #tpu.memory_space<smem>>
    %133 = vector.broadcast %132 : f32 to vector<1x128xf32>
    %134 = arith.mulf %133, %5 : vector<1x128xf32>
    %135 = arith.addf %131, %134 : vector<1x128xf32>
    %c6_61 = arith.constant 6 : index
    %136 = memref.load %arg3[%c6_61] : memref<8xf32, #tpu.memory_space<smem>>
    %137 = vector.broadcast %136 : f32 to vector<1x128xf32>
    %138 = arith.addf %135, %137 : vector<1x128xf32>
    %c6_62 = arith.constant 6 : index
    %139 = memref.load %arg4[%c6_62] : memref<8xf32, #tpu.memory_space<smem>>
    %cst_63 = arith.constant 0.000000e+00 : f32
    %140 = vector.broadcast %cst_63 : f32 to vector<1x128xf32>
    %141 = arith.maximumf %138, %140 : vector<1x128xf32>
    %142 = vector.broadcast %139 : f32 to vector<1x128xf32>
    %143 = arith.mulf %142, %141 : vector<1x128xf32>
    %144 = arith.addf %124, %143 : vector<1x128xf32>
    %c0_64 = arith.constant 0 : index
    %c7 = arith.constant 7 : index
    %145 = memref.load %arg2[%c0_64, %c7] : memref<3x8xf32, #tpu.memory_space<smem>>
    %146 = vector.broadcast %145 : f32 to vector<1x128xf32>
    %147 = arith.mulf %146, %1 : vector<1x128xf32>
    %c1_65 = arith.constant 1 : index
    %c7_66 = arith.constant 7 : index
    %148 = memref.load %arg2[%c1_65, %c7_66] : memref<3x8xf32, #tpu.memory_space<smem>>
    %149 = vector.broadcast %148 : f32 to vector<1x128xf32>
    %150 = arith.mulf %149, %3 : vector<1x128xf32>
    %151 = arith.addf %147, %150 : vector<1x128xf32>
    %c2_67 = arith.constant 2 : index
    %c7_68 = arith.constant 7 : index
    %152 = memref.load %arg2[%c2_67, %c7_68] : memref<3x8xf32, #tpu.memory_space<smem>>
    %153 = vector.broadcast %152 : f32 to vector<1x128xf32>
    %154 = arith.mulf %153, %5 : vector<1x128xf32>
    %155 = arith.addf %151, %154 : vector<1x128xf32>
    %c7_69 = arith.constant 7 : index
    %156 = memref.load %arg3[%c7_69] : memref<8xf32, #tpu.memory_space<smem>>
    %157 = vector.broadcast %156 : f32 to vector<1x128xf32>
    %158 = arith.addf %155, %157 : vector<1x128xf32>
    %c7_70 = arith.constant 7 : index
    %159 = memref.load %arg4[%c7_70] : memref<8xf32, #tpu.memory_space<smem>>
    %cst_71 = arith.constant 0.000000e+00 : f32
    %160 = vector.broadcast %cst_71 : f32 to vector<1x128xf32>
    %161 = arith.maximumf %158, %160 : vector<1x128xf32>
    %162 = vector.broadcast %159 : f32 to vector<1x128xf32>
    %163 = arith.mulf %162, %161 : vector<1x128xf32>
    %164 = arith.addf %144, %163 : vector<1x128xf32>
    %c0_72 = arith.constant 0 : index
    %165 = memref.load %arg5[%c0_72] : memref<1xf32, #tpu.memory_space<smem>>
    %166 = vector.broadcast %165 : f32 to vector<1x128xf32>
    %167 = arith.addf %164, %166 : vector<1x128xf32>
    %c0_73 = arith.constant 0 : index
    %c0_74 = arith.constant 0 : index
    %168 = vector.load %arg6[%c0_73, %c0_74] : memref<1x128xf32, #tpu.memory_space<vmem>>, vector<1x128xf32>
    tpu.vector_store %arg6[%c0_73, %c0_74], %167 {strides = array<i32>} : memref<1x128xf32, #tpu.memory_space<vmem>>, vector<1x128xf32>,
    return
  }
  func.func @transform_0(%arg0: i32) -> (i32, i32, i32) {
    %c0_i32 = arith.constant 0 : i32
    %c0_i32_0 = arith.constant 0 : i32
    %c0_i32_1 = arith.constant 0 : i32
    return %c0_i32, %arg0, %c0_i32_0 : i32, i32, i32
  }
  func.func @transform_1(%arg0: i32) -> (i32, i32) {
    %c0_i32 = arith.constant 0 : i32
    %c0_i32_0 = arith.constant 0 : i32
    %c0_i32_1 = arith.constant 0 : i32
    return %c0_i32, %c0_i32_0 : i32, i32
  }
  func.func @transform_2(%arg0: i32) -> i32 {
    %c0_i32 = arith.constant 0 : i32
    %c0_i32_0 = arith.constant 0 : i32
    return %c0_i32 : i32
  }
  func.func @transform_3(%arg0: i32) -> i32 {
    %c0_i32 = arith.constant 0 : i32
    %c0_i32_0 = arith.constant 0 : i32
    return %c0_i32 : i32
  }
  func.func @transform_4(%arg0: i32) -> i32 {
    %c0_i32 = arith.constant 0 : i32
    %c0_i32_0 = arith.constant 0 : i32
    return %c0_i32 : i32
  }
  func.func @transform_5(%arg0: i32) -> (i32, i32) {
    %c0_i32 = arith.constant 0 : i32
    %c0_i32_0 = arith.constant 0 : i32
    return %arg0, %c0_i32 : i32, i32
  }
}

</mosaic_0001>

<bundles_post_ra>
// kernel: tpu_custom_call.1
= control target key start
LH: loop header
LB: loop body
LE: loop exit
PB: predicated region body
PF: predicated region fallthrough
CT: control target
= control target key end

     0   :  { %11 = vsyncpa [#allocation5], 0  ;;  %s537_s0 = inlined_call_operand.vmem [shape: f32[3,1,128], index: 0, kind: input, shape index: {}]   ;;  %s538_s1 = inlined_call_operand.vmem [shape: f32[3,8], index: 1, kind: input, shape index: {}]   ;;  %s539_s2 = inlined_call_operand.vmem [shape: f32[8], index: 2, kind: input, shape index: {}]   ;;  %s540_s3 = inlined_call_operand.vmem [shape: f32[8], index: 3, kind: input, shape index: {}]   ;;  %s541_s4 = inlined_call_operand.<no memory space> [shape: f32[1], index: 4, kind: input, shape index: {}]   ;;  %s542_s5 = inlined_call_operand.hbm [shape: f32[1,128], index: 5, kind: output, shape index: {}]  }
   0x1   :  { %12 = vsyncpa [#allocation7], 0  ;;  %s32_s20 = sshll.u32 %s539_s2, 4  ;;  %s33_s20 = int_to_ptr.vmem [resolvable:$true] %s32_s20 }
   0x2   :  { %13 = vsyncpa [#allocation4], 0  ;;  %s22_s23 = sshll.u32 %s538_s1, 4  ;;  %s277_s24 = scalar_lea.vmem %s33_s20, 16  ;;  %s23_s23 = int_to_ptr.vmem [resolvable:$true] %s22_s23 }
   0x3   :  { %p278_p0 = scmp.ne.s32.totalorder %s33_s20, %s277_s24  ;;  %p282_p1 = scmp.lt.s32.totalorder %s33_s20, %s33_s20 }
   0x4   :  { %p283_p2 = scmp.lt.s32.totalorder %s277_s24, %s277_s24 }
   0x6   :  { %p284_p3 = por %p283_p2, %p282_p1 }
   0x8   :  { %p285_p4 = pnand %p284_p3, %p278_p0 }
   0xa   :  { %288 = shalt.err (!%p285_p4)
}
   0xb   :  { %s341_s25 = smov [#allocation6]   ;;  %s289_s26 = scalar_lea.vmem %s23_s23, 64 }
   0xc   :  { %35 = dma.vmem_to_smem %s33_s20, 16, %s341_s25, [#allocation7]  }
   0xd   :  { %p290_p5 = scmp.ne.s32.totalorder %s23_s23, %s289_s26  ;;  %p294_p6 = scmp.lt.s32.totalorder %s23_s23, %s23_s23 }
   0xe   :  { %p295_p7 = scmp.lt.s32.totalorder %s289_s26, %s289_s26 }
  0x10   :  { %p296_p8 = por %p295_p7, %p294_p6 }
  0x12   :  { %p297_p9 = pnand %p296_p8, %p290_p5 }
  0x14   :  { %300 = shalt.err (!%p297_p9)
}
  0x15   :  { %s342_s2 = smov [#allocation3]   ;;  %s42_s28 = sshll.u32 %s540_s3, 4  ;;  %s43_s28 = int_to_ptr.vmem [resolvable:$true] %s42_s28 }
  0x16   :  { %25 = dma.vmem_to_smem %s23_s23, 64, %s342_s2, [#allocation5]  }
  0x17   :  { %s301_s29 = scalar_lea.vmem %s43_s28, 16  ;;  %p306_p11 = scmp.lt.s32.totalorder %s43_s28, %s43_s28 }
  0x18   :  { %p302_p10 = scmp.ne.s32.totalorder %s43_s28, %s301_s29  ;;  %p307_p12 = scmp.lt.s32.totalorder %s301_s29, %s301_s29 }
  0x1a   :  { %p308_p13 = por %p307_p12, %p306_p11 }
  0x1c   :  { %p309_p0 = pnand %p308_p13, %p302_p10 }
  0x1e   :  { %312 = shalt.err (!%p309_p0)
}
  0x1f   :  { %s343_s30 = smov [#allocation8]  }
  0x20   :  { %45 = dma.vmem_to_smem %s43_s28, 16, %s343_s30, [#allocation7]  }
  0x21   :  { %335 = dma.done.wait [#allocation5], 64  }
  0x22   :  { %336 = vsyncadd [#allocation5], 4294967232 }
  0x23   :  { %337 = dma.done.wait [#allocation7], 32  }
  0x24   :  { %338 = vsyncadd [#allocation7], 4294967264 }
  0x25   :  { %57 = sfence }
  0x26   :  { %s63_s6 = sld [smem:[#allocation3]]  ;;  %s238_s10 = sld [smem:[#allocation3 + $0x1]]  ;;  %v391_v0 = vld [vmem:[%s537_s0] sm:$0x1]  ;;  %v396_v1 = vld [vmem:[%s537_s0 + $0x1] sm:$0x1] }
  0x27   :  { %s236_s7 = sld [smem:[#allocation3 + $0x80]]  ;;  %s239_s13 = sld [smem:[#allocation3 + $0x81]]  ;;  %v405_v2 = vld [vmem:[%s537_s0 + $0x2] sm:$0x1] }
  0x28   :  { %s237_s8 = sld [smem:[#allocation3 + $0x100]]  ;;  %s240_s14 = sld [smem:[#allocation3 + $0x101]] }
  0x29   :  { %s384_s9 = sld [smem:[#allocation6]]  ;;  %s398_s17 = sld [smem:[#allocation6 + $0x1]] }
  0x2a   :  { %s386_s3 = sld [smem:[#allocation8]]  ;;  %s400_s18 = sld [smem:[#allocation8 + $0x1]] }
  0x2b   :  { %s407_s21 = sld [smem:[#allocation3 + $0x2]]  ;;  %s419_s0 = sld [smem:[#allocation3 + $0x3]] }
  0x2c   :  { %s409_s22 = sld [smem:[#allocation3 + $0x82]]  ;;  %v64_v3 = vstv %s63_s6  ;;  %v82_v9 = vstv %s238_s10  ;;  %s422_s26 = sld [smem:[#allocation3 + $0x83]] }
  0x2d   :  { %v67_v4 = vstv %s236_s7  ;;  %s411_s23 = sld [smem:[#allocation3 + $0x102]]  ;;  %v65_v5 = vmul.f32 %v64_v3, %v391_v0  ;;  %s424_s2 = sld [smem:[#allocation3 + $0x103]]  ;;  %v83_v11 = vmul.f32 %v82_v9, %v391_v0  ;;  %v85_v12 = vstv %s239_s13 }
  0x2e   :  { %s413_s24 = sld [smem:[#allocation6 + $0x2]]  ;;  %v68_v6 = vmul.f32 %v396_v1, %v67_v4  ;;  %v71_v7 = vstv %s237_s8  ;;  %v89_v13 = vstv %s240_s14  ;;  %s427_s1 = sld [smem:[#allocation6 + $0x3]]  ;;  %v86_v16 = vmul.f32 %v396_v1, %v85_v12 }
  0x2f   :  { %s417_s25 = sld [smem:[#allocation8 + $0x2]]  ;;  %v72_v8 = vmul.f32 %v405_v2, %v71_v7  ;;  %v75_v14 = vstv %s384_s9  ;;  %v90_v17 = vmul.f32 %v405_v2, %v89_v13  ;;  %s433_s27 = sld [smem:[#allocation3 + $0x4]]  ;;  %v93_v19 = vstv %s398_s17 }
  0x30   :  { %v69_v10 = vadd.f32 %v68_v6, %v65_v5  ;;  %v79_v15 = vstv %s386_s3  ;;  %s435_s28 = sld [smem:[#allocation3 + $0x84]]  ;;  %s440_s29 = sld [smem:[#allocation8 + $0x3]]  ;;  %v87_v22 = vadd.f32 %v86_v16, %v83_v11  ;;  %v97_v27 = vstv %s400_s18 }
  0x31   :  { %v101_v20 = vstv %s407_s21  ;;  %s442_s30 = sld [smem:[#allocation3 + $0x104]]  ;;  %s452_s7 = sld [smem:[#allocation3 + $0x5]]  ;;  %v120_v32 = vstv %s419_s0 }
  0x32   :  { %v73_v18 = vadd.f32 %v72_v8, %v69_v10  ;;  %v104_v21 = vstv %s409_s22  ;;  %v102_v23 = vmul.f32 %v101_v20, %v391_v0  ;;  %s447_s6 = sld [smem:[#allocation6 + $0x4]]  ;;  %s454_s8 = sld [smem:[#allocation3 + $0x85]]  ;;  %v91_v30 = vadd.f32 %v90_v17, %v87_v22 }
  0x33   :  { %v105_v24 = vmul.f32 %v396_v1, %v104_v21  ;;  %v108_v25 = vstv %s411_s23  ;;  %v123_v33 = vstv %s422_s26  ;;  %v121_v35 = vmul.f32 %v120_v32, %v391_v0  ;;  %s461_s9 = sld [smem:[#allocation8 + $0x4]]  ;;  %s463_s3 = sld [smem:[#allocation3 + $0x105]] }
  0x34   :  { %v76_v26 = vadd.f32 %v75_v14, %v73_v18  ;;  %v109_v28 = vmul.f32 %v405_v2, %v108_v25  ;;  %v112_v29 = vstv %s413_s24  ;;  %v124_v36 = vmul.f32 %v396_v1, %v123_v33  ;;  %s467_s10 = sld [smem:[#allocation6 + $0x5]]  ;;  %s471_s11 = sld [smem:[#allocation3 + $0x6]] }
  0x35   :  { %v106_v31 = vadd.f32 %v105_v24, %v102_v23  ;;  %v127_v37 = vstv %s424_s2  ;;  %v94_v38 = vadd.f32 %v93_v19, %v91_v30  ;;  %v116_v40 = vstv %s417_s25  ;;  %s473_s12 = sld [smem:[#allocation3 + $0x86]]  ;;  %s482_s14 = sld [smem:[#allocation8 + $0x5]] }
  0x36   :  { %v78_v34 = vmax.f32 %v76_v26, 0.0  ;;  %v128_v41 = vmul.f32 %v405_v2, %v127_v37  ;;  %v125_v43 = vadd.f32 %v124_v36, %v121_v35  ;;  %v131_v44 = vstv %s427_s1  ;;  %s477_s13 = sld [smem:[#allocation3 + $0x106]]  ;;  %s488_s16 = sld [smem:[#allocation3 + $0x7]] }
  0x37   :  { %v110_v39 = vadd.f32 %v109_v28, %v106_v31  ;;  %v139_v45 = vstv %s433_s27  ;;  %v96_v46 = vmax.f32 %v94_v38, 0.0  ;;  %v142_v49 = vstv %s435_s28  ;;  %s486_s15 = sld [smem:[#allocation6 + $0x6]]  ;;  %s492_s17 = sld [smem:[#allocation3 + $0x87]] }
  0x38   :  { %v80_v42 = vmul.f32 %v79_v15, %v78_v34  ;;  %v140_v48 = vmul.f32 %v139_v45, %v391_v0  ;;  %v129_v50 = vadd.f32 %v128_v41, %v125_v43  ;;  %v135_v51 = vstv %s440_s29  ;;  %s494_s18 = sld [smem:[#allocation3 + $0x107]]  ;;  %s504_s19 = sld [smem:[#allocation8 + $0x6]] }
  0x39   :  { %v113_v47 = vadd.f32 %v112_v29, %v110_v39  ;;  %v143_v52 = vmul.f32 %v396_v1, %v142_v49  ;;  %v146_v53 = vstv %s442_s30  ;;  %v98_v54 = vmul.f32 %v97_v27, %v96_v46  ;;  %s506_s20 = sld [smem:[#allocation6 + $0x7]]  ;;  %s344_s24 = smov [#allocation9]  }
  0x3a   :  { %v147_v56 = vmul.f32 %v405_v2, %v146_v53  ;;  %v150_v57 = vstv %s447_s6  ;;  %v132_v58 = vadd.f32 %v131_v44, %v129_v50  ;;  %v158_v60 = vstv %s452_s7  ;;  %s272_s21 = sld [smem:[#allocation8 + $0x7]]  ;;  %s224_s25 = sshll.u32 %s344_s24, 4  ;;  %s225_s25 = int_to_ptr.vmem [resolvable:$true] %s224_s25 }
  0x3b   :  { %v115_v55 = vmax.f32 %v113_v47, 0.0  ;;  %v144_v59 = vadd.f32 %v143_v52, %v140_v48  ;;  %v161_v61 = vstv %s454_s8  ;;  %v99_v62 = vadd.f32 %v98_v54, %v80_v42  ;;  %s313_s0 = scalar_lea.vmem %s225_s25, 16  ;;  %s317_s26 = scalar_lea.vmem %s225_s25, 32 }
  0x3c   :  { %v159_v3 = vmul.f32 %v158_v60, %v391_v0  ;;  %v162_v4 = vmul.f32 %v396_v1, %v161_v61  ;;  %v134_v5 = vmax.f32 %v132_v58, 0.0  ;;  %v154_v7 = vstv %s461_s9  ;;  %p314_p1 = scmp.ne.s32.totalorder %s225_s25, %s313_s0  ;;  %p318_p2 = scmp.lt.s32.totalorder %s225_s25, %s225_s25 }
  0x3d   :  { %v117_v63 = vmul.f32 %v116_v40, %v115_v55  ;;  %v148_v6 = vadd.f32 %v147_v56, %v144_v59  ;;  %v165_v8 = vstv %s463_s3  ;;  %v169_v12 = vstv %s467_s10  ;;  %p319_p3 = scmp.lt.s32.totalorder %s317_s26, %s313_s0 }
  0x3e   :  { %v163_v10 = vadd.f32 %v162_v4, %v159_v3  ;;  %v166_v11 = vmul.f32 %v405_v2, %v165_v8  ;;  %v136_v13 = vmul.f32 %v135_v51, %v134_v5  ;;  %v177_v15 = vstv %s471_s11 }
  0x3f   :  { %v118_v9 = vadd.f32 %v117_v63, %v99_v62  ;;  %v151_v14 = vadd.f32 %v150_v57, %v148_v6  ;;  %v180_v16 = vstv %s473_s12  ;;  %v178_v18 = vmul.f32 %v177_v15, %v391_v0  ;;  %p320_p4 = por %p319_p3, %p318_p2 }
  0x40   :  { %v167_v17 = vadd.f32 %v166_v11, %v163_v10  ;;  %v181_v19 = vmul.f32 %v396_v1, %v180_v16  ;;  %v184_v20 = vstv %s477_s13  ;;  %v173_v23 = vstv %s482_s14 }
  0x41   :  { %v137_v21 = vadd.f32 %v136_v13, %v118_v9  ;;  %v153_v22 = vmax.f32 %v151_v14, 0.0  ;;  %v185_v24 = vmul.f32 %v405_v2, %v184_v20  ;;  %v188_v27 = vstv %s486_s15  ;;  %p321_p5 = pnand %p320_p4, %p314_p1 }
  0x42   :  { %v170_v25 = vadd.f32 %v169_v12, %v167_v17  ;;  %v182_v26 = vadd.f32 %v181_v19, %v178_v18  ;;  %v196_v28 = vstv %s488_s16  ;;  %v199_v31 = vstv %s492_s17 }
  0x43   :  { %v155_v29 = vmul.f32 %v154_v7, %v153_v22  ;;  %v197_v30 = vmul.f32 %v196_v28, %v391_v0  ;;  %v203_v32 = vstv %s494_s18  ;;  %v200_v35 = vmul.f32 %v396_v1, %v199_v31 }
  0x44   :  { %v172_v33 = vmax.f32 %v170_v25, 0.0  ;;  %v186_v34 = vadd.f32 %v185_v24, %v182_v26  ;;  %v204_v36 = vmul.f32 %v405_v2, %v203_v32  ;;  %v192_v41 = vstv %s504_s19 }
  0x45   :  { %v156_v37 = vadd.f32 %v155_v29, %v137_v21  ;;  %v201_v40 = vadd.f32 %v200_v35, %v197_v30  ;;  %v207_v42 = vstv %s506_s20  ;;  %v211_v47 = vstv %s272_s21 }
  0x46   :  { %v174_v38 = vmul.f32 %v173_v23, %v172_v33  ;;  %v189_v39 = vadd.f32 %v188_v27, %v186_v34  ;;  %v215_v1 = vstv %s541_s4 }
  0x47   :  { %v205_v45 = vadd.f32 %v204_v36, %v201_v40 }
  0x48   :  { %v175_v43 = vadd.f32 %v174_v38, %v156_v37  ;;  %v191_v44 = vmax.f32 %v189_v39, 0.0 }
  0x49   :  { %v208_v0 = vadd.f32 %v207_v42, %v205_v45 }
  0x4a   :  { %v193_v46 = vmul.f32 %v192_v41, %v191_v44 }
  0x4b   :  { %v210_v49 = vmax.f32 %v208_v0, 0.0 }
  0x4c   :  { %v194_v48 = vadd.f32 %v193_v46, %v175_v43 }
  0x4d   :  { %v212_v50 = vmul.f32 %v211_v47, %v210_v49 }
  0x4f   :  { %v213_v2 = vadd.f32 %v212_v50, %v194_v48 }
  0x51   :  { %v216_v51 = vadd.f32 %v215_v1, %v213_v2 }
  0x53   :  { %217 = vst [vmem:[#allocation9] sm:$0x1] %v216_v51 }
  0x54   :  { %324 = shalt.err (!%p321_p5)
}
  0x55   :  { %s325_s27 = scalar_lea.hbm %s542_s5, 16 }
  0x56   :  { %p326_p6 = scmp.ne.s32.totalorder %s542_s5, %s325_s27  ;;  %p329_p7 = scmp.lt.u32.totalorder %s325_s27, %s542_s5 }
  0x58   :  { %p331_p8 = pnand %p329_p7, %p326_p6 }
  0x5a   :  { %334 = shalt.err (!%p331_p8)
}
  0x5b   :  { %227 = dma.vmem_to_hbm [thread:$0]  %s225_s25, 16, %s542_s5, [#allocation4]  }
  0x5c   :  { %339 = dma.done.wait [#allocation4], 16  }
  0x5d   :  { %340 = vsyncadd [#allocation4], 4294967280 }
  0x5e   :  { %231 = vsyncpa [#allocation4], 1 }
  0x5f   :  { %232 = vsyncpa [#allocation5], 1 }
  0x60   :  { %233 = vsyncpa [#allocation7], 1 }

</bundles_post_ra>
